<compile_context>
chip_gen: v7x
topology: tpu7x:2x2x1
jax: 0.10.0
libtpu: 0.0.40
codegen_flags: <defaults>
</compile_context>

<pallas_src>
import functools
import math

import jax
import jax.numpy as jnp
from jax import lax
from jax.experimental import pallas as pl
from jax.experimental.pallas import tpu as pltpu


# ---------------------------------------------------------------------------
# VMEM budget helper: derived from per-step block bytes, clamped below physical
# VMEM with headroom (v7x has 64 MiB/TC, v5e/v6e 128 MiB).
# ---------------------------------------------------------------------------
def _vmem_limit(bytes_per_step):
    phys = 64 * 1024 * 1024                       # conservative (v7x) fallback
    try:
        phys = int(pltpu.get_tpu_info().vmem_capacity_bytes)
    except Exception:
        pass
    cap = max(phys - max(phys // 4, 8 * 1024 * 1024), 16 * 1024 * 1024)
    want = int(bytes_per_step) * 3 // 2 + 4 * 1024 * 1024
    return int(min(max(want, 16 * 1024 * 1024), cap))


# ---------------------------------------------------------------------------
# Kernel 1: fused, row-tiled Q/K/V projection (bf16 operands, f32 accumulate).
#   x2: (N, H) bf16 with N = B*S; fused weights w3: (H, 3H) bf16 (q-scale folded
#   in); fused bias b3: (1, 3H) f32.  One (TM,H)@(H,3H) MXU matmul per grid step.
# ---------------------------------------------------------------------------
def qkv_proj_kernel(x_ref, w_ref, b_ref, q_ref, k_ref, v_ref, *, hidden):
    y = jnp.dot(x_ref[...], w_ref[...],
                preferred_element_type=jnp.float32) + b_ref[...]
    q_ref[...] = y[:, :hidden].astype(q_ref.dtype)
    k_ref[...] = y[:, hidden:2 * hidden].astype(k_ref.dtype)
    v_ref[...] = y[:, 2 * hidden:].astype(v_ref.dtype)


def qkv_projection(x2, w3, b3, *, hidden, tm=None):
    N, H = x2.shape
    H3 = w3.shape[1]
    if tm is None:
        tm = N if N <= 512 else 512
    grid = (pl.cdiv(N, tm),)
    row_out = pl.BlockSpec((tm, H), lambda i: (i, 0))

    bytes_per_step = (2 * tm * H * 2          # x block, double-buffered, bf16
                      + 2 * H * H3 * 2        # resident weight (double-buffered)
                      + 2 * H3 * 4            # bias
                      + 3 * 2 * tm * H * 2)   # q/k/v output blocks, bf16
    cost = pl.CostEstimate(
        flops=int(2 * N * H * H3),
        transcendentals=0,
        bytes_accessed=int(N * H * 2 + H * H3 * 2 + H3 * 4 + 3 * N * H * 2))

    return pl.pallas_call(
        functools.partial(qkv_proj_kernel, hidden=hidden),
        out_shape=tuple(jax.ShapeDtypeStruct((N, H), jnp.bfloat16) for _ in range(3)),
        grid=grid,
        in_specs=[
            pl.BlockSpec((tm, H), lambda i: (i, 0)),     # x rows (pipelined)
            pl.BlockSpec((H, H3), lambda i: (0, 0)),     # fused W (resident, bf16)
            pl.BlockSpec((1, H3), lambda i: (0, 0)),     # fused bias (resident)
        ],
        out_specs=(row_out, row_out, row_out),
        compiler_params=pltpu.CompilerParams(
            dimension_semantics=("parallel",),
            vmem_limit_bytes=_vmem_limit(bytes_per_step)),
        cost_estimate=cost,
    )(x2, w3, b3)


# ---------------------------------------------------------------------------
# Kernel 2: per-(batch, head-group) edge-softmax attention + 5-step propagation.
#   q/k/v: (B, S, H) bf16, out: (B, S, H) f32; heads tiled onto the grid in
#   lane-dense groups (group width = heads_per_group * head_dim).
#   bias: (B, 1, S) additive mask bias (0 = attend, -1e9 = masked source node).
#   Single bf16 (S, S) scratch holds the (1-alpha)-scaled attention matrix.
# ---------------------------------------------------------------------------
def attn_propagate_kernel(bias_ref, q_ref, k_ref, v_ref, o_ref, a_scratch,
                          *, heads_per_group, head_dim, alpha, n_iters):
    bias = bias_ref[0]                               # (1, S) over key (source) nodes
    outs = []
    for j in range(heads_per_group):                 # static unroll (small)
        c0 = j * head_dim
        c1 = c0 + head_dim
        q = q_ref[0, :, c0:c1]                       # (S, D) bf16, 1/sqrt(D) folded in
        k = k_ref[0, :, c0:c1]                       # (S, D) bf16
        v = v_ref[0, :, c0:c1]                       # (S, D) bf16

        # Fused: score(u->dst)=k[u].q[dst] -> +mask bias -> max-sub -> exp ->
        # approx-reciprocal normalize -> *(1-alpha) -> single bf16 scratch store.
        s = lax.dot_general(q, k, (((1,), (1,)), ((), ())),
                            preferred_element_type=jnp.float32) + bias   # (S, S) f32
        p = jnp.exp(s - jnp.max(s, axis=-1, keepdims=True))
        inv = pl.reciprocal(jnp.sum(p, axis=-1, keepdims=True), approx=True)
        a_scratch[...] = ((1.0 - alpha) * inv * p).astype(a_scratch.dtype)
        a = a_scratch[...]                            # (S, S) bf16 MXU operand

        # h = v;  repeat: h <- (1-alpha)*(A@h) + alpha*v  (dropout = identity).
        v_f32 = v.astype(jnp.float32)
        v_alpha = alpha * v_f32
        h_b = v                                       # bf16 operand for first matmul
        h = v_f32
        for it in range(n_iters):
            h = jnp.dot(a, h_b, preferred_element_type=jnp.float32) + v_alpha
            if it + 1 < n_iters:
                h_b = h.astype(jnp.bfloat16)
        outs.append(h)

    # Assemble the whole group in vregs and store once (lane-dense when GW>=128).
    o_ref[0, :, :] = jnp.concatenate(outs, axis=-1).astype(o_ref.dtype)


def _heads_per_group(num_heads, head_dim):
    # Smallest divisor of num_heads whose group width is a multiple of 128 lanes
    # (lane-dense blocks / stores); fall back to all heads (full hidden width).
    for cand in range(1, num_heads + 1):
        if num_heads % cand == 0 and (cand * head_dim) % 128 == 0:
            return cand
    return num_heads


def attention_propagate(bias, q3, k3, v3, *, num_heads, head_dim, alpha, n_iters):
    B, S, H = q3.shape
    hpg = _heads_per_group(num_heads, head_dim)
    gw = hpg * head_dim
    G = num_heads // hpg

    blk = pl.BlockSpec((1, S, gw), lambda b, g: (b, 0, g))
    bias_spec = pl.BlockSpec((1, 1, S), lambda b, g: (b, 0, 0))

    bytes_per_step = (3 * 2 * S * gw * 2       # q/k/v bf16 blocks, double-buffered
                      + 2 * S * gw * 4         # f32 output block, double-buffered
                      + 2 * S * 4              # bias block
                      + S * S * 2)             # bf16 attention scratch
    cost = pl.CostEstimate(
        flops=int(2 * B * num_heads * S * S * head_dim * (1 + n_iters)),
        transcendentals=int(B * num_heads * S * S),
        bytes_accessed=int(B * (3 * S * H * 2 + S * H * 4) + B * G * S * 4))

    return pl.pallas_call(
        functools.partial(attn_propagate_kernel, heads_per_group=hpg,
                          head_dim=head_dim, alpha=alpha, n_iters=n_iters),
        out_shape=jax.ShapeDtypeStruct((B, S, H), jnp.float32),
        grid=(B, G),
        in_specs=[bias_spec, blk, blk, blk],
        out_specs=blk,
        scratch_shapes=[
            pltpu.VMEM((S, S), jnp.bfloat16),   # (1-alpha)-scaled attention probs
        ],
        compiler_params=pltpu.CompilerParams(
            dimension_semantics=("parallel", "parallel"),
            vmem_limit_bytes=_vmem_limit(bytes_per_step)),
        cost_estimate=cost,
    )(bias, q3, k3, v3)


# ---------------------------------------------------------------------------
# Parameter fusion (done ONCE at setup, not per forward): fuse q/k/v weights,
# fold the 1/sqrt(head_dim) query scale into wq/bq, cast weights to bf16.
# ---------------------------------------------------------------------------
def fuse_qkv_params(params, *, num_heads, hidden):
    wq, wk, wv, bq, bk, bv = params
    scale = 1.0 / math.sqrt(hidden // num_heads)
    w3 = jnp.concatenate([wq * scale, wk, wv], axis=1).astype(jnp.bfloat16)  # (H,3H)
    b3 = jnp.concatenate([bq * scale, bk, bv], axis=1).astype(jnp.float32)   # (1,3H)
    return w3, b3


# ---------------------------------------------------------------------------
# Wrapper: full DiffuserSelfAttention forward (inference mode).
# ---------------------------------------------------------------------------
def diffuser_self_attention(x, attention_mask, fused_params, *, num_heads,
                            alpha=0.1, n_iters=5):
    B, S, H = x.shape
    assert H % num_heads == 0
    D = H // num_heads
    w3, b3 = fused_params

    q2, k2, v2 = qkv_projection(x.reshape(B * S, H).astype(jnp.bfloat16),
                                w3, b3, hidden=H)

    # (B*S, H) -> (B, S, H): metadata-only reshape, no HBM transposes anywhere.
    q3 = q2.reshape(B, S, H)
    k3 = k2.reshape(B, S, H)
    v3 = v2.reshape(B, S, H)

    # Additive mask bias over key (source) nodes: 0 = attend, -1e9 = masked.
    bias = jnp.where(attention_mask >= 0, 0.0, -1e9).astype(jnp.float32)
    bias = bias.reshape(B, 1, S)

    out = attention_propagate(bias, q3, k3, v3, num_heads=num_heads, head_dim=D,
                              alpha=alpha, n_iters=n_iters)
    return out                                      # (B, S, H) f32


# ---------------------------------------------------------------------------
# Pure-JAX reference (same semantics) for a sanity check.
# ---------------------------------------------------------------------------
def reference(x, attention_mask, params, *, num_heads, alpha=0.1, n_iters=5):
    wq, wk, wv, bq, bk, bv = params
    B, S, H = x.shape
    D = H // num_heads
    q = (x @ wq + bq) / math.sqrt(D)
    k = x @ wk + bk
    v = x @ wv + bv
    rs = lambda t: t.reshape(B, S, num_heads, D).transpose(0, 2, 1, 3)
    q, k, v = rs(q), rs(k), rs(v)
    s = jnp.einsum('bhqd,bhkd->bhqk', q, k)
    valid = (attention_mask >= 0)[:, None, None, :]
    s = jnp.where(valid, s, -1e9)
    a = jax.nn.softmax(s, axis=-1)
    h = v
    for _ in range(n_iters):
        h = (1.0 - alpha) * jnp.einsum('bhqk,bhkd->bhqd', a, h) + alpha * v
    return h.transpose(0, 2, 1, 3).reshape(B, S, H)


if __name__ == "__main__":
    B, S, H, NH = 2, 8, 32, 4   # batch, seq, hidden_size, num_attention_heads

    key = jax.random.PRNGKey(0)
    kx, kwq, kwk, kwv, kbq, kbk, kbv = jax.random.split(key, 7)

    x = jax.random.normal(kx, (B, S, H), jnp.float32)
    # Deterministic synthetic parameters (nn.Linear(H, H) x3); stored as (in, out).
    wq = jax.random.normal(kwq, (H, H), jnp.float32) * 0.05
    wk = jax.random.normal(kwk, (H, H), jnp.float32) * 0.05
    wv = jax.random.normal(kwv, (H, H), jnp.float32) * 0.05
    bq = jax.random.normal(kbq, (1, H), jnp.float32) * 0.01
    bk = jax.random.normal(kbk, (1, H), jnp.float32) * 0.01
    bv = jax.random.normal(kbv, (1, H), jnp.float32) * 0.01
    params = (wq, wk, wv, bq, bk, bv)

    # Weight fusion + scale folding done once at parameter setup (hoisted).
    fused = fuse_qkv_params(params, num_heads=NH, hidden=H)

    # HF-style attention_mask: 0 = attend, negative = masked (bool_mask = mask >= 0).
    attention_mask = jnp.zeros((B, S), jnp.float32).at[:, -1].set(-10000.0)

    out = diffuser_self_attention(x, attention_mask, fused, num_heads=NH)
    out = jax.block_until_ready(out)

    ref = reference(x, attention_mask, params, num_heads=NH)
    assert out.shape == (B, S, H)
    assert bool(jnp.all(jnp.isfinite(out)))
    # bf16 q/k/v/weights + bf16 attention probs + approx reciprocal -> loose tolerance.
    assert bool(jnp.allclose(out, ref, atol=3e-2, rtol=3e-2)), "mismatch vs reference"

    print("KERNEL_OK")
</pallas_src>

<mosaic_0001>
module attributes {stable_mosaic.version = 11 : i64} {
  func.func @qkv_proj_kernel(%arg0: i32, %arg1: memref<16x32xbf16, #tpu.memory_space<vmem>>, %arg2: memref<32x96xbf16, #tpu.memory_space<vmem>>, %arg3: memref<1x96xf32, #tpu.memory_space<vmem>>, %arg4: memref<16x32xbf16, #tpu.memory_space<vmem>>, %arg5: memref<16x32xbf16, #tpu.memory_space<vmem>>, %arg6: memref<16x32xbf16, #tpu.memory_space<vmem>>) attributes {dimension_semantics = [#tpu.dimension_semantics<parallel>], iteration_bounds = array<i64: 1>, scalar_prefetch = 0 : i64, scratch_operands = 0 : i64, tpu.core_type = #tpu.core_type<tc>, window_params = [{transform_indices = @transform_0, window_bounds = array<i64: 16, 32>}, {pipeline_mode = #tpu.pipeline_mode<synchronous>, transform_indices = @transform_1, window_bounds = array<i64: 32, 96>}, {pipeline_mode = #tpu.pipeline_mode<synchronous>, transform_indices = @transform_2, window_bounds = array<i64: 1, 96>}, {transform_indices = @transform_3, window_bounds = array<i64: 16, 32>}, {transform_indices = @transform_4, window_bounds = array<i64: 16, 32>}, {transform_indices = @transform_5, window_bounds = array<i64: 16, 32>}]} {
    %c0 = arith.constant 0 : index
    %c0_0 = arith.constant 0 : index
    %0 = vector.load %arg1[%c0, %c0_0] : memref<16x32xbf16, #tpu.memory_space<vmem>>, vector<16x32xbf16>
    %c0_1 = arith.constant 0 : index
    %c0_2 = arith.constant 0 : index
    %1 = vector.load %arg2[%c0_1, %c0_2] : memref<32x96xbf16, #tpu.memory_space<vmem>>, vector<32x96xbf16>
    %cst = arith.constant dense<0.000000e+00> : vector<16x96xf32>
    %2 = tpu.matmul %0, %1, %cst {dimension_numbers = #tpu.dot_dimension_numbers<[1], [0], [0], [1], [0, 0, 1, 1], [], []>} : vector<16x32xbf16>, vector<32x96xbf16>, vector<16x96xf32> -> vector<16x96xf32>
    %c0_3 = arith.constant 0 : index
    %c0_4 = arith.constant 0 : index
    %3 = vector.load %arg3[%c0_3, %c0_4] : memref<1x96xf32, #tpu.memory_space<vmem>>, vector<1x96xf32>
    %4 = vector.broadcast %3 : vector<1x96xf32> to vector<16x96xf32>
    %5 = arith.addf %2, %4 : vector<16x96xf32>
    %6 = vector.extract_strided_slice %5 {offsets = [0, 0], sizes = [16, 32], strides = [1, 1]} : vector<16x96xf32> to vector<16x32xf32>
    %7 = arith.truncf %6 : vector<16x32xf32> to vector<16x32xbf16>
    %c0_5 = arith.constant 0 : index
    %c0_6 = arith.constant 0 : index
    %8 = vector.load %arg4[%c0_5, %c0_6] : memref<16x32xbf16, #tpu.memory_space<vmem>>, vector<16x32xbf16>
    tpu.vector_store %arg4[%c0_5, %c0_6], %7 {strides = array<i32>} : memref<16x32xbf16, #tpu.memory_space<vmem>>, vector<16x32xbf16>,
    %9 = vector.extract_strided_slice %5 {offsets = [0, 32], sizes = [16, 32], strides = [1, 1]} : vector<16x96xf32> to vector<16x32xf32>
    %10 = arith.truncf %9 : vector<16x32xf32> to vector<16x32xbf16>
    %c0_7 = arith.constant 0 : index
    %c0_8 = arith.constant 0 : index
    %11 = vector.load %arg5[%c0_7, %c0_8] : memref<16x32xbf16, #tpu.memory_space<vmem>>, vector<16x32xbf16>
    tpu.vector_store %arg5[%c0_7, %c0_8], %10 {strides = array<i32>} : memref<16x32xbf16, #tpu.memory_space<vmem>>, vector<16x32xbf16>,
    %12 = vector.extract_strided_slice %5 {offsets = [0, 64], sizes = [16, 32], strides = [1, 1]} : vector<16x96xf32> to vector<16x32xf32>
    %13 = arith.truncf %12 : vector<16x32xf32> to vector<16x32xbf16>
    %c0_9 = arith.constant 0 : index
    %c0_10 = arith.constant 0 : index
    %14 = vector.load %arg6[%c0_9, %c0_10] : memref<16x32xbf16, #tpu.memory_space<vmem>>, vector<16x32xbf16>
    tpu.vector_store %arg6[%c0_9, %c0_10], %13 {strides = array<i32>} : memref<16x32xbf16, #tpu.memory_space<vmem>>, vector<16x32xbf16>,
    return
  }
  func.func @transform_0(%arg0: i32) -> (i32, i32) {
    %c0_i32 = arith.constant 0 : i32
    %c0_i32_0 = arith.constant 0 : i32
    return %arg0, %c0_i32 : i32, i32
  }
  func.func @transform_1(%arg0: i32) -> (i32, i32) {
    %c0_i32 = arith.constant 0 : i32
    %c0_i32_0 = arith.constant 0 : i32
    %c0_i32_1 = arith.constant 0 : i32
    return %c0_i32, %c0_i32_0 : i32, i32
  }
  func.func @transform_2(%arg0: i32) -> (i32, i32) {
    %c0_i32 = arith.constant 0 : i32
    %c0_i32_0 = arith.constant 0 : i32
    %c0_i32_1 = arith.constant 0 : i32
    return %c0_i32, %c0_i32_0 : i32, i32
  }
  func.func @transform_3(%arg0: i32) -> (i32, i32) {
    %c0_i32 = arith.constant 0 : i32
    %c0_i32_0 = arith.constant 0 : i32
    return %arg0, %c0_i32 : i32, i32
  }
  func.func @transform_4(%arg0: i32) -> (i32, i32) {
    %c0_i32 = arith.constant 0 : i32
    %c0_i32_0 = arith.constant 0 : i32
    return %arg0, %c0_i32 : i32, i32
  }
  func.func @transform_5(%arg0: i32) -> (i32, i32) {
    %c0_i32 = arith.constant 0 : i32
    %c0_i32_0 = arith.constant 0 : i32
    return %arg0, %c0_i32 : i32, i32
  }
}

</mosaic_0001>

<bundles_post_ra>
// kernel: tpu_custom_call.1
= control target key start
LH: loop header
LB: loop body
LE: loop exit
PB: predicated region body
PF: predicated region fallthrough
CT: control target
= control target key end

     0   :  { %11 = vsyncpa [#allocation3], 0  ;;  %s483_s0 = inlined_call_operand.hbm [shape: bf16[16,32], index: 0, kind: input, shape index: {}]   ;;  %s484_s1 = inlined_call_operand.hbm [shape: bf16[32,96], index: 1, kind: input, shape index: {}]   ;;  %s485_s2 = inlined_call_operand.vmem [shape: f32[1,96], index: 2, kind: input, shape index: {}]   ;;  %s486_s3 = inlined_call_operand.hbm [shape: bf16[16,32], index: 3, kind: output, shape index: {0}]   ;;  %s487_s4 = inlined_call_operand.hbm [shape: bf16[16,32], index: 4, kind: output, shape index: {1}]   ;;  %s488_s5 = inlined_call_operand.hbm [shape: bf16[16,32], index: 5, kind: output, shape index: {2}]  }
   0x1   :  { %12 = vsyncpa [#allocation6], 0 }
   0x2   :  { %13 = vsyncpa [#allocation4], 0 }
   0x3   :  { %14 = vsyncpa [#allocation9], 0  ;;  %s350_s18 = smov [#allocation2]   ;;  %s232_s22 = scalar_lea.hbm %s483_s0, 128 }
   0x4   :  { %s20_s19 = sshll.u32 %s350_s18, 4  ;;  %p233_p0 = scmp.ne.s32.totalorder %s483_s0, %s232_s22  ;;  %s21_s19 = int_to_ptr.vmem [resolvable:$true] %s20_s19 }
   0x5   :  { %p236_p1 = scmp.lt.u32.totalorder %s232_s22, %s483_s0 }
   0x7   :  { %p238_p2 = pnand %p236_p1, %p233_p0 }
   0x9   :  { %241 = shalt.err (!%p238_p2)
}
   0xa   :  { %s242_s27 = scalar_lea.vmem %s21_s19, 128  ;;  %p247_p4 = scmp.lt.s32.totalorder %s21_s19, %s21_s19 }
   0xb   :  { %p243_p3 = scmp.ne.s32.totalorder %s21_s19, %s242_s27  ;;  %p248_p5 = scmp.lt.s32.totalorder %s242_s27, %s242_s27 }
   0xd   :  { %p249_p6 = por %p248_p5, %p247_p4 }
   0xf   :  { %p250_p7 = pnand %p249_p6, %p243_p3 }
  0x11   :  { %253 = shalt.err (!%p250_p7)
}
  0x12   :  { %s351_s28 = smov 64   ;;  %s352_s29 = smov 4  }
  0x13   :  { %26 = dma.hbm_to_vmem [thread:$0]  %s483_s0, 128, %s21_s19, [#allocation3], %s351_s28, %s351_s28, %s352_s29  }
  0x14   :  { %s353_s7 = smov [#allocation5]   ;;  %s254_s11 = scalar_lea.hbm %s484_s1, 256 }
  0x15   :  { %s32_s8 = sshll.u32 %s353_s7, 4  ;;  %p255_p8 = scmp.ne.s32.totalorder %s484_s1, %s254_s11  ;;  %s33_s8 = int_to_ptr.vmem [resolvable:$true] %s32_s8 }
  0x16   :  { %p258_p9 = scmp.lt.u32.totalorder %s254_s11, %s484_s1 }
  0x18   :  { %p260_p10 = pnand %p258_p9, %p255_p8 }
  0x1a   :  { %263 = shalt.err (!%p260_p10)
}
  0x1b   :  { %s264_s16 = scalar_lea.vmem %s33_s8, 256  ;;  %p269_p12 = scmp.lt.s32.totalorder %s33_s8, %s33_s8 }
  0x1c   :  { %p265_p11 = scmp.ne.s32.totalorder %s33_s8, %s264_s16  ;;  %p270_p13 = scmp.lt.s32.totalorder %s264_s16, %s264_s16 }
  0x1e   :  { %p271_p0 = por %p270_p13, %p269_p12 }
  0x20   :  { %p272_p1 = pnand %p271_p0, %p265_p11 }
  0x22   :  { %275 = shalt.err (!%p272_p1)
}
  0x23   :  { %38 = dma.hbm_to_vmem [thread:$0]  %s484_s1, 256, %s33_s8, [#allocation6], %s351_s28, %s351_s28, %s352_s29  }
  0x24   :  { %342 = dma.done.wait [#allocation3], 128  }
  0x25   :  { %343 = vsyncadd [#allocation3], 4294967168 }
  0x26   :  { %344 = dma.done.wait [#allocation6], 256  }
  0x27   :  { %345 = vsyncadd [#allocation6], 4294967040  ;;  %v354_v0 = vmov 0.0   ;;  %vm355_vm0 = vmmov 0   ;;  %v229_v1 = vld [vmem:[#allocation5] sm:$0xff]   ;;  %v230_v2 = vld [vmem:[#allocation5 + $0x8] sm:$0xff]  }
  0x28   :  { %211 = vmatprep.subr.bf16.mxu0 %v354_v0  ;;  %215 = vmatprep.mubr.msk.bf16.mxu0 %vm355_vm0, %v354_v0  ;;  %v231_v3 = vld [vmem:[#allocation2] sm:$0xff]   ;;  %vm78_vm1 = vcmask 261120   ;;  %vm131_vm2 = vcmask 257024   ;;  %s356_s1 = smov [#allocation7]   ;;  %s357_s21 = smov 96  }
  0x29   :  { %212 = vmatpush3.bf16.msra.mxu0 %v229_v1  ;;  %v199_v4 = vld [vmem:[%s485_s2] ss:$0 sm:$0xff]  ;;  %s155_s20 = sshll.u32 %s356_s1, 4  ;;  %s156_s20 = int_to_ptr.vmem [resolvable:$true] %s155_s20 }
  0x2a   :  { %213 = vmatprep.subr.bf16.mxu0 %v354_v0  ;;  %s276_s2 = scalar_lea.vmem %s156_s20, 128  ;;  %p281_p3 = scmp.lt.s32.totalorder %s156_s20, %s156_s20 }
  0x2b   :  { %p277_p2 = scmp.ne.s32.totalorder %s156_s20, %s276_s2  ;;  %p282_p4 = scmp.lt.s32.totalorder %s276_s2, %s276_s2 }
  0x2d   :  { %214 = vmatpush3.bf16.msra.mxu0 %v230_v2  ;;  %p283_p5 = por %p282_p4, %p281_p3 }
  0x2f   :  { %p284_p6 = pnand %p283_p5, %p277_p2 }
  0x30   :  { %216 = vmatmul.mubr.msk.bf16.vlgmr.msra.gmra.mrb[0].mxu0 %vm78_vm1, %v231_v3 }
 0x103   :  { %v116_v5 = vpop.f32.mrb[0].mxu0 }
 0x104   :  { %v117_v6 = vadd.f32 %v199_v4, %v116_v5  ;;  %v217_v7 = vpop.f32.mrb[1].mxu0 }
 0x105   :  { %v119_v8 = vpop.f32.mrb[2].mxu0 }
 0x106   :  { %v206_v9 = vpack.c.bf16 %v117_v6, %v117_v6  ;;  %v120_v10 = vadd.f32 %v199_v4, %v119_v8  ;;  %v218_v11 = vpop.f32.mrb[3].mxu0 }
 0x108   :  { %v207_v12 = vpack.c.bf16 %v120_v10, %v120_v10  ;;  %142 = vrot.lane.b32.xlu1 %v206_v9, %s351_s28  ;;  %134 = vrot.lane.b32.xlu0 %v206_v9, %s357_s21  ;;  %132 = vst.msk [vmem:[#allocation7] sm:$0xf] %vm131_vm2, %v206_v9 }
 0x10a   :  { %133 = vst.msk [vmem:[#allocation7 + $0x4] sm:$0xf] %vm131_vm2, %v207_v12 }
 0x10b   :  { %287 = shalt.err (!%p284_p6)
}
 0x10c   :  { %s288_s24 = scalar_lea.hbm %s486_s3, 128 }
 0x10d   :  { %p289_p7 = scmp.ne.s32.totalorder %s486_s3, %s288_s24  ;;  %p292_p8 = scmp.lt.u32.totalorder %s288_s24, %s486_s3 }
 0x10f   :  { %p294_p9 = pnand %p292_p8, %p289_p7 }
 0x111   :  { %297 = shalt.err (!%p294_p9)
}
 0x112   :  { %161 = dma.vmem_to_hbm [thread:$0]  %s156_s20, 128, %s486_s3, [#allocation4], %s351_s28, %s351_s28, %s352_s29  }
 0x113   :  { %144 = vrot.lane.b32.xlu1 %v207_v12, %s351_s28  ;;  %136 = vrot.lane.b32.xlu0 %v207_v12, %s357_s21  ;;  %s358_s8 = smov [#allocation8]   ;;  %s359_s10 = smov [#allocation10]  }
 0x114   :  { %s167_s9 = sshll.u32 %s358_s8, 4  ;;  %s179_s11 = sshll.u32 %s359_s10, 4  ;;  %s168_s9 = int_to_ptr.vmem [resolvable:$true] %s167_s9  ;;  %s444_s11 = int_to_ptr.vmem [resolvable:$true] %s179_s11 }
 0x115   :  { %s298_s3 = scalar_lea.vmem %s168_s9, 128  ;;  %p303_p11 = scmp.lt.s32.totalorder %s168_s9, %s168_s9 }
 0x116   :  { %p299_p10 = scmp.ne.s32.totalorder %s168_s9, %s298_s3  ;;  %p304_p12 = scmp.lt.s32.totalorder %s298_s3, %s298_s3 }
 0x118   :  { %p305_p13 = por %p304_p12, %p303_p11 }
 0x11a   :  { %p306_p0 = pnand %p305_p13, %p299_p10 }
 0x17a   :  { %v143_v13 = vpop.permute.xlu1 %142  ;;  %v135_v14 = vpop.permute.xlu0 %134 }
 0x17b   :  { %148 = vst.msk [vmem:[#allocation10] sm:$0xf] %vm131_vm2, %v143_v13  ;;  %140 = vst.msk [vmem:[#allocation8] sm:$0xf] %vm131_vm2, %v135_v14 }
 0x185   :  { %v145_v15 = vpop.permute.xlu1 %144  ;;  %v137_v16 = vpop.permute.xlu0 %136 }
 0x186   :  { %149 = vst.msk [vmem:[#allocation10 + $0x4] sm:$0xf] %vm131_vm2, %v145_v15  ;;  %141 = vst.msk [vmem:[#allocation8 + $0x4] sm:$0xf] %vm131_vm2, %v137_v16 }
 0x187   :  { %309 = shalt.err (!%p306_p0)
}
 0x188   :  { %s310_s14 = scalar_lea.hbm %s487_s4, 128 }
 0x189   :  { %p311_p1 = scmp.ne.s32.totalorder %s487_s4, %s310_s14  ;;  %p314_p2 = scmp.lt.u32.totalorder %s310_s14, %s487_s4 }
 0x18b   :  { %p316_p3 = pnand %p314_p2, %p311_p1 }
 0x18d   :  { %319 = shalt.err (!%p316_p3)
}
 0x18e   :  { %173 = dma.vmem_to_hbm [thread:$0]  %s168_s9, 128, %s487_s4, [#allocation9], %s351_s28, %s351_s28, %s352_s29  }
 0x18f   :  { %s320_s1 = scalar_lea.vmem %s444_s11, 128  ;;  %p325_p5 = scmp.lt.s32.totalorder %s444_s11, %s444_s11 }
 0x190   :  { %p321_p4 = scmp.ne.s32.totalorder %s444_s11, %s320_s1  ;;  %p326_p6 = scmp.lt.s32.totalorder %s320_s1, %s320_s1 }
 0x192   :  { %p327_p7 = por %p326_p6, %p325_p5 }
 0x194   :  { %p328_p8 = pnand %p327_p7, %p321_p4 }
 0x196   :  { %331 = shalt.err (!%p328_p8)
}
 0x197   :  { %s332_s2 = scalar_lea.hbm %s488_s5, 128 }
 0x198   :  { %p333_p9 = scmp.ne.s32.totalorder %s488_s5, %s332_s2  ;;  %p336_p10 = scmp.lt.u32.totalorder %s332_s2, %s488_s5 }
 0x19a   :  { %p338_p11 = pnand %p336_p10, %p333_p9 }
 0x19c   :  { %341 = shalt.err (!%p338_p11)
}
 0x19d   :  { %185 = dma.vmem_to_hbm [thread:$0]  %s444_s11, 128, %s488_s5, [#allocation9], %s351_s28, %s351_s28, %s352_s29  }
 0x19e   :  { %346 = dma.done.wait [#allocation4], 128  }
 0x19f   :  { %347 = vsyncadd [#allocation4], 4294967168 }
 0x1a0   :  { %348 = dma.done.wait [#allocation9], 256  }
 0x1a1   :  { %349 = vsyncadd [#allocation9], 4294967040 }
 0x1a2   :  { %195 = vsyncpa [#allocation3], 1 }
 0x1a3   :  { %196 = vsyncpa [#allocation6], 1 }
 0x1a4   :  { %197 = vsyncpa [#allocation4], 1 }
 0x1a5   :  { %198 = vsyncpa [#allocation9], 1 }

</bundles_post_ra>
